<compile_context>
chip_gen: v7x
topology: tpu7x:2x2x1
jax: 0.10.0
libtpu: 0.0.40
codegen_flags: <defaults>
</compile_context>

<pallas_src>
import math

import jax
import jax.numpy as jnp
from jax.experimental import pallas as pl
from jax.experimental.pallas import tpu as pltpu


_LANE = 128
# ~1 MiB per pipelined buffer; with double-buffered x + out and a resident pe
# tile the total footprint stays ~4-6 MiB -> safe on v5e/v6e/v7x.
_TILE_BYTES_TARGET = 1 << 20


def _round_up(n: int, m: int) -> int:
    return ((n + m - 1) // m) * m


def _pos_enc_kernel(x_ref, pe_ref, o_ref):
    """One grid step.

    x_ref  : (tile_b, T) VMEM -- lane-dense flattened activation tile
    pe_ref : (1, T)      VMEM -- positional-encoding tile (resident across the
                                 inner batch-tile grid axis, broadcast on add)
    o_ref  : (tile_b, T) VMEM
    """
    o_ref[...] = x_ref[...] + pe_ref[...]


def make_pe_table(d_model: int, max_seq_len: int) -> jax.Array:
    """Replicates the PyTorch buffer construction (sin even cols, cos odd)."""
    position = jnp.arange(max_seq_len, dtype=jnp.float32)[:, None]            # (L, 1)
    div_term = jnp.exp(
        jnp.arange(0, d_model, 2, dtype=jnp.float32) * (-math.log(10000.0) / d_model)
    )                                                                          # (D/2,)
    angles = position * div_term                                               # (L, D/2)
    pe = jnp.zeros((max_seq_len, d_model), jnp.float32)
    pe = pe.at[:, 0::2].set(jnp.sin(angles))
    pe = pe.at[:, 1::2].set(jnp.cos(angles))
    return pe


def _pick_batch_tile(B: int, itemsize: int) -> int:
    """Batch-tile rows: full extent, or a multiple of 8 dividing B (layout rule)."""
    max_rows = max(1, _TILE_BYTES_TARGET // (_LANE * itemsize))
    if B <= max_rows:
        return B
    tb = (max_rows // 8) * 8
    while tb >= 8:
        if B % tb == 0:
            return tb
        tb -= 8
    return B  # no legal sub-tiling; take the whole batch axis


def _pick_lane_tile(L_pad: int, tile_b: int, itemsize: int) -> int:
    """Largest multiple of 128 dividing L_pad with tile_b*T*itemsize <= budget."""
    k = L_pad // _LANE
    budget_elems = max(_LANE, _TILE_BYTES_TARGET // (tile_b * itemsize))
    best = 1
    for d in range(1, k + 1):
        if k % d == 0 and d * _LANE <= budget_elems:
            best = d
    return best * _LANE


def _pos_enc_pallas(x_flat: jax.Array, pe_flat: jax.Array) -> jax.Array:
    """x_flat: (B, L_pad) lane-dense; pe_flat: (1, >= L_pad), same dtype."""
    B, L_pad = x_flat.shape
    itemsize = jnp.dtype(x_flat.dtype).itemsize

    tile_b = _pick_batch_tile(B, itemsize)
    T = _pick_lane_tile(L_pad, tile_b, itemsize)

    n_j = L_pad // T
    n_b = B // tile_b

    return pl.pallas_call(
        _pos_enc_kernel,
        out_shape=jax.ShapeDtypeStruct((B, L_pad), x_flat.dtype),
        grid_spec=pltpu.PrefetchScalarGridSpec(
            num_scalar_prefetch=0,
            # batch-tile axis innermost: the pe tile (index constant along b)
            # stays VMEM-resident across the whole batch sweep.
            grid=(n_j, n_b),
            in_specs=[
                pl.BlockSpec((tile_b, T), lambda j, b: (b, j)),   # x
                pl.BlockSpec((1, T), lambda j, b: (0, j)),        # pe (broadcast)
            ],
            out_specs=pl.BlockSpec((tile_b, T), lambda j, b: (b, j)),
        ),
        # Output reuses x_flat's HBM buffer when donatable (op is in-place-able).
        input_output_aliases={0: 0},
        compiler_params=pltpu.CompilerParams(
            dimension_semantics=("parallel", "parallel"),   # megacore on v7x
            vmem_limit_bytes=32 * 1024 * 1024,
        ),
    )(x_flat, pe_flat)


@jax.jit
def _pe_forward(x: jax.Array, pe_flat: jax.Array) -> jax.Array:
    """x: (B, S, D); pe_flat: (1, round_up(max_seq_len*D, 128)) in target dtype."""
    B, S, D = x.shape
    L = S * D
    L_pad = _round_up(L, _LANE)

    # Lane-dense plumbing: flatten (S, D) -> S*D and pad up to a multiple of
    # 128 so stores are unmasked full-vreg vst.
    x_flat = x.reshape(B, L)
    if L_pad != L:
        x_flat = jnp.pad(x_flat, ((0, 0), (0, L_pad - L)))

    # pe was cast/flattened/padded at init; the row-major flatten of (pos, dim)
    # means flat element k of pe matches flat element k of x for any S <=
    # max_seq_len, so no per-call slice of pe is needed.
    pe_flat = pe_flat.astype(x.dtype)  # no-op when dtypes already match

    out_flat = _pos_enc_pallas(x_flat, pe_flat)
    if L_pad != L:
        out_flat = out_flat[:, :L]
    return out_flat.reshape(B, S, D)


class PositionalEncoding:
    """JAX/Pallas port of the PyTorch PositionalEncoding module (dropout=0)."""

    def __init__(self, d_model: int, max_seq_len: int, dropout: float = 0.0,
                 dtype=jnp.float32):
        self.d_model = d_model
        self.max_seq_len = max_seq_len
        if dropout > 0:
            # TODO(synk): dropout > 0 (training-mode RNG) not implemented.
            raise NotImplementedError("dropout > 0 not supported in this kernel")

        # Buffer built ONCE: flattened, lane-padded, dtype-cast.
        # (Casting pe to the compute dtype here mirrors adding in x's dtype;
        #  PyTorch would promote to f32 — difference is negligible.)
        pe = make_pe_table(d_model, max_seq_len)
        L_max = max_seq_len * d_model
        L_max_pad = _round_up(L_max, _LANE)
        pe_flat = pe.reshape(1, L_max).astype(dtype)
        if L_max_pad != L_max:
            pe_flat = jnp.pad(pe_flat, ((0, 0), (0, L_max_pad - L_max)))
        self.pe_flat = pe_flat

    def __call__(self, x: jax.Array) -> jax.Array:
        B, S, D = x.shape
        if S > self.max_seq_len:
            raise ValueError(
                f"Expected sequence length {S} <= {self.max_seq_len} in Position Encoder."
            )
        if D != self.d_model:
            raise ValueError(f"Expected d_model={self.d_model}, got {D}.")
        return _pe_forward(x, self.pe_flat)


def _reference(x, pe):
    """Pure-JAX replica of the PyTorch forward (dropout=0 -> Identity)."""
    S = x.shape[1]
    return x + pe[None, :S, :].astype(x.dtype)


if __name__ == "__main__":
    key = jax.random.PRNGKey(0)

    # Case 1: lane-aligned shape (S*D multiple of 128).
    B, S, d_model, max_seq_len = 2, 8, 32, 16
    x = jax.random.normal(key, (B, S, d_model), jnp.float32)
    module = PositionalEncoding(d_model, max_seq_len, dropout=0.0, dtype=jnp.float32)
    out = jax.block_until_ready(module(x))
    ref = _reference(x, make_pe_table(d_model, max_seq_len))
    assert out.shape == (B, S, d_model)
    assert jnp.allclose(out, ref, atol=1e-6, rtol=1e-6), "mismatch vs reference (case 1)"

    # Case 2: non-lane-aligned shape (exercises the padding path).
    B2, S2, d2, L2 = 2, 5, 24, 16
    x2 = jax.random.normal(jax.random.PRNGKey(1), (B2, S2, d2), jnp.float32)
    module2 = PositionalEncoding(d2, L2, dropout=0.0, dtype=jnp.float32)
    out2 = jax.block_until_ready(module2(x2))
    ref2 = _reference(x2, make_pe_table(d2, L2))
    assert out2.shape == (B2, S2, d2)
    assert jnp.allclose(out2, ref2, atol=1e-6, rtol=1e-6), "mismatch vs reference (case 2)"

    print("KERNEL_OK")
</pallas_src>

<mosaic_0001>
module attributes {stable_mosaic.version = 11 : i64} {
  func.func @_pos_enc_kernel(%arg0: i32, %arg1: i32, %arg2: memref<2x256xf32, #tpu.memory_space<vmem>>, %arg3: memref<1x256xf32, #tpu.memory_space<vmem>>, %arg4: memref<2x256xf32, #tpu.memory_space<vmem>>) attributes {dimension_semantics = [#tpu.dimension_semantics<parallel>, #tpu.dimension_semantics<parallel>], iteration_bounds = array<i64: 1, 1>, scalar_prefetch = 0 : i64, scratch_operands = 0 : i64, tpu.core_type = #tpu.core_type<tc>, window_params = [{transform_indices = @transform_0, window_bounds = array<i64: 2, 256>}, {transform_indices = @transform_1, window_bounds = array<i64: 1, 256>}, {transform_indices = @transform_2, window_bounds = array<i64: 2, 256>}]} {
    %c0 = arith.constant 0 : index
    %c0_0 = arith.constant 0 : index
    %0 = vector.load %arg2[%c0, %c0_0] : memref<2x256xf32, #tpu.memory_space<vmem>>, vector<2x256xf32>
    %c0_1 = arith.constant 0 : index
    %c0_2 = arith.constant 0 : index
    %1 = vector.load %arg3[%c0_1, %c0_2] : memref<1x256xf32, #tpu.memory_space<vmem>>, vector<1x256xf32>
    %2 = vector.broadcast %1 : vector<1x256xf32> to vector<2x256xf32>
    %3 = arith.addf %0, %2 : vector<2x256xf32>
    %c0_3 = arith.constant 0 : index
    %c0_4 = arith.constant 0 : index
    %4 = vector.load %arg4[%c0_3, %c0_4] : memref<2x256xf32, #tpu.memory_space<vmem>>, vector<2x256xf32>
    tpu.vector_store %arg4[%c0_3, %c0_4], %3 {strides = array<i32>} : memref<2x256xf32, #tpu.memory_space<vmem>>, vector<2x256xf32>,
    return
  }
  func.func @transform_0(%arg0: i32, %arg1: i32) -> (i32, i32) {
    %c0_i32 = arith.constant 0 : i32
    return %arg1, %arg0 : i32, i32
  }
  func.func @transform_1(%arg0: i32, %arg1: i32) -> (i32, i32) {
    %c0_i32 = arith.constant 0 : i32
    %c0_i32_0 = arith.constant 0 : i32
    return %c0_i32, %arg0 : i32, i32
  }
  func.func @transform_2(%arg0: i32, %arg1: i32) -> (i32, i32) {
    %c0_i32 = arith.constant 0 : i32
    return %arg1, %arg0 : i32, i32
  }
}

</mosaic_0001>

<bundles_post_ra>
// kernel: _pe_forward.1
= control target key start
LH: loop header
LB: loop body
LE: loop exit
PB: predicated region body
PF: predicated region fallthrough
CT: control target
= control target key end

     0   :  { %v14_v0 = vlaneseq  ;;  %v38_v1 = vmov 1983009808   ;;  %s63_s1 = inlined_call_operand.vmem [shape: f32[1,512], index: 1, kind: input, shape index: {}]   ;;  %s64_s0 = inlined_call_operand.vmem [shape: f32[2,256], index: 0, kind: input, shape index: {}, may-alias: {0,2}]   ;;  %s65_s2 = inlined_call_operand.vmem [shape: f32[2,256], index: 2, kind: output, shape index: {}, may-alias: {0,2}]  }
   0x1   :  { %v24_v2 = vunpack.c.l.s4 %v38_v1  ;;  %v12_v4 = vld [vmem:[%s63_s1] sm:$0x3] }
   0x2   :  { %v15_v3 = vshrl.u32 %v14_v0, 7  ;;  %v11_v12 = vld [vmem:[%s64_s0] sm:$0xf] }
   0x3   :  { %v25_v5 = vunpack.c.0.s8 %v24_v2 }
   0x4   :  { %v16_v6 = vsub.s32 0, %v15_v3  ;;  %v20_v7 = vsub.s32 1, %v15_v3 }
   0x5   :  { %v28_v10 = vsub.s32 %v25_v5, %v15_v3 }
   0x6   :  { %v17_v8 = vrot.slane %v12_v4, %v16_v6  ;;  %v21_v9 = vrot.slane %v12_v4, %v20_v7 }
   0x8   :  { %v22_v11 = vcombine.low %v17_v8, %v21_v9 }
   0xa   :  { %v29_v13 = vrot.slane %v22_v11, %v28_v10 }
   0xc   :  { %v31_v14 = vadd.f32 %v29_v13, %v11_v12 }
   0xe   :  { %32 = vst [vmem:[%s65_s2] sm:$0xf] %v31_v14 }

</bundles_post_ra>
